<compile_context>
chip_gen: v7x
topology: tpu7x:2x2x1
jax: 0.10.0
libtpu: 0.0.40
codegen_flags: <defaults>
</compile_context>

<pallas_src>
import functools
from typing import Iterable, List

import numpy as np
import jax
import jax.numpy as jnp
from jax.experimental import pallas as pl
from jax.experimental.pallas import tpu as pltpu


_VMEM_LIMIT_BYTES = 48 << 20    # below v7x's 64 MiB physical VMEM, > default scoped limit
_TILE_TARGET_BYTES = 16 << 20   # per-buffer (in+out) tile budget; 2x double-buffer < limit


def _largest_divisor_le(n: int, cap: int) -> int:
    cap = max(1, min(int(cap), n))
    for d in range(cap, 0, -1):
        if n % d == 0:
            return d
    return 1


# ----------------------------------------------------------------------------
# Kernels
# ----------------------------------------------------------------------------
def _pad_rows_flat_kernel(x_ref, o_ref, *, hlW, HW, hrW, value):
    """Spatial H-only padding on a flattened (N, C, H*W) view (lane-dense)."""
    # x_ref: (1, C_BLK, H*W)   o_ref: (1, C_BLK, (hl+H+hr)*W)
    cb = o_ref.shape[1]
    if hlW > 0:
        o_ref[0, :, pl.ds(0, hlW)] = jnp.full((cb, hlW), value, o_ref.dtype)
    o_ref[0, :, pl.ds(hlW, HW)] = x_ref[0]
    if hrW > 0:
        o_ref[0, :, pl.ds(hlW + HW, hrW)] = jnp.full((cb, hrW), value, o_ref.dtype)


def _pad_hw_kernel(x_ref, o_ref, *, hl, hr, wl, wr, H, W, value):
    """Spatial H/W padding, border-only stores (interior written once)."""
    # x_ref: (1, C_BLK, H, W)   o_ref: (1, C_BLK, hl+H+hr, wl+W+wr)
    cb = o_ref.shape[1]
    Wp = wl + W + wr
    if hl > 0:
        o_ref[0, :, pl.ds(0, hl), :] = jnp.full((cb, hl, Wp), value, o_ref.dtype)
    if hr > 0:
        o_ref[0, :, pl.ds(hl + H, hr), :] = jnp.full((cb, hr, Wp), value, o_ref.dtype)
    if wl > 0:
        o_ref[0, :, pl.ds(hl, H), pl.ds(0, wl)] = jnp.full((cb, H, wl), value, o_ref.dtype)
    if wr > 0:
        o_ref[0, :, pl.ds(hl, H), pl.ds(wl + W, wr)] = jnp.full((cb, H, wr), value, o_ref.dtype)
    o_ref[0, :, pl.ds(hl, H), pl.ds(wl, W)] = x_ref[0]


def _pad_full_kernel(x_ref, o_ref, *, N, C, H, W, hl, hr, wl, wr, cl, nl, value):
    """General fallback: per-(n, c) plane, handles N/C halo planes via pl.when."""
    n = pl.program_id(0)
    c = pl.program_id(1)
    in_region = (n >= nl) & (n < nl + N) & (c >= cl) & (c < cl + C)
    Wp = wl + W + wr

    @pl.when(in_region)
    def _():
        if hl > 0:
            o_ref[0, 0, pl.ds(0, hl), :] = jnp.full((hl, Wp), value, o_ref.dtype)
        if hr > 0:
            o_ref[0, 0, pl.ds(hl + H, hr), :] = jnp.full((hr, Wp), value, o_ref.dtype)
        if wl > 0:
            o_ref[0, 0, pl.ds(hl, H), pl.ds(0, wl)] = jnp.full((H, wl), value, o_ref.dtype)
        if wr > 0:
            o_ref[0, 0, pl.ds(hl, H), pl.ds(wl + W, wr)] = jnp.full((H, wr), value, o_ref.dtype)
        o_ref[0, 0, pl.ds(hl, H), pl.ds(wl, W)] = x_ref[0, 0]

    @pl.when(jnp.logical_not(in_region))
    def _():
        o_ref[...] = jnp.full(o_ref.shape, value, o_ref.dtype)


# ----------------------------------------------------------------------------
# Wrappers
# ----------------------------------------------------------------------------
def _spatial_pad(x, hl, hr, wl, wr, value):
    """Fast path: padding only on H/W. Coarsened multi-channel blocks."""
    N, C, H, W = x.shape
    Hp, Wp = H + hl + hr, W + wl + wr
    itemsize = jnp.dtype(x.dtype).itemsize
    sublane = max(8, 32 // itemsize)  # sublane multiple for packed dtypes

    per_c_bytes = (H * W + Hp * Wp) * itemsize
    c_cap = max(1, _TILE_TARGET_BYTES // per_c_bytes)
    c_blk = _largest_divisor_le(C, c_cap)
    # v7x megacore: keep at least 2 programs along the parallel grid axes.
    if N == 1 and c_blk == C and C > 1:
        c_blk = _largest_divisor_le(C, max(1, C // 2))
    grid = (N, C // c_blk)

    cost = pl.CostEstimate(
        flops=0, transcendentals=0,
        bytes_accessed=(N * C * H * W + N * C * Hp * Wp) * itemsize)
    cparams = pltpu.CompilerParams(
        dimension_semantics=("parallel", "parallel"),
        vmem_limit_bytes=_VMEM_LIMIT_BYTES)

    # Lane-dense path: no W padding -> flatten (H, W) into the last dim so all
    # stores are wide slabs instead of Wp-wide masked stores.  Needs the block's
    # second-to-last dim (C_BLK) to be full-C or sublane aligned.
    if wl == 0 and wr == 0 and (c_blk == C or c_blk % sublane == 0):
        xf = x.reshape(N, C, H * W)
        kernel = functools.partial(
            _pad_rows_flat_kernel, hlW=hl * W, HW=H * W, hrW=hr * W, value=value)
        out = pl.pallas_call(
            kernel,
            out_shape=jax.ShapeDtypeStruct((N, C, Hp * W), x.dtype),
            grid=grid,
            in_specs=[pl.BlockSpec((1, c_blk, H * W), lambda n, c: (n, c, 0))],
            out_specs=pl.BlockSpec((1, c_blk, Hp * W), lambda n, c: (n, c, 0)),
            compiler_params=cparams,
            cost_estimate=cost,
        )(xf)
        return out.reshape(N, C, Hp, W)

    kernel = functools.partial(
        _pad_hw_kernel, hl=hl, hr=hr, wl=wl, wr=wr, H=H, W=W, value=value)
    return pl.pallas_call(
        kernel,
        out_shape=jax.ShapeDtypeStruct((N, C, Hp, Wp), x.dtype),
        grid=grid,
        in_specs=[pl.BlockSpec((1, c_blk, H, W), lambda n, c: (n, c, 0, 0))],
        out_specs=pl.BlockSpec((1, c_blk, Hp, Wp), lambda n, c: (n, c, 0, 0)),
        compiler_params=cparams,
        cost_estimate=cost,
    )(x)


def _full_pad(x, pad8, value):
    """General path: N and/or C padding present (rare). Per-plane grid."""
    wl, wr, hl, hr, cl, cr, nl, nr = pad8
    N, C, H, W = x.shape
    Np, Cp, Hp, Wp = N + nl + nr, C + cl + cr, H + hl + hr, W + wl + wr
    itemsize = jnp.dtype(x.dtype).itemsize

    kernel = functools.partial(
        _pad_full_kernel, N=N, C=C, H=H, W=W,
        hl=hl, hr=hr, wl=wl, wr=wr, cl=cl, nl=nl, value=value)

    def in_index_map(n, c):
        # Clamp to a valid input block; the kernel ignores the data for planes
        # lying entirely in the padded N/C halo.
        ni = jnp.clip(n - nl, 0, N - 1)
        ci = jnp.clip(c - cl, 0, C - 1)
        return (ni, ci, 0, 0)

    cost = pl.CostEstimate(
        flops=0, transcendentals=0,
        bytes_accessed=(N * C * H * W + Np * Cp * Hp * Wp) * itemsize)

    return pl.pallas_call(
        kernel,
        out_shape=jax.ShapeDtypeStruct((Np, Cp, Hp, Wp), x.dtype),
        grid=(Np, Cp),
        in_specs=[pl.BlockSpec((1, 1, H, W), in_index_map)],
        out_specs=pl.BlockSpec((1, 1, Hp, Wp), lambda n, c: (n, c, 0, 0)),
        compiler_params=pltpu.CompilerParams(
            dimension_semantics=("parallel", "parallel"),
            vmem_limit_bytes=_VMEM_LIMIT_BYTES),
        cost_estimate=cost,
    )(x)


def rev_pad2d_forward(x, pad8, value=0.0):
    """Constant-pad a 4D NCHW array; pad8 = [wl, wr, hl, hr, cl, cr, nl, nr]."""
    assert x.ndim == 4, "RevPad2D expects a 4D NCHW tensor"
    pad8 = [int(p) for p in pad8]
    if any(p < 0 for p in pad8):
        # TODO(synk): negative (cropping) pads of F.pad constant mode are not implemented.
        raise NotImplementedError("RevPad2D Pallas kernel: negative pads unsupported")
    if sum(pad8) == 0:
        return x
    wl, wr, hl, hr, cl, cr, nl, nr = pad8
    if nl == nr == cl == cr == 0:
        return _spatial_pad(x, hl, hr, wl, wr, value)
    return _full_pad(x, pad8, value)


class RevPad2D:
    """JAX/Pallas port of the PyTorch RevPad2D module (forward pass)."""

    def __init__(self, pad: List, mode='constant', value=0):
        assert isinstance(pad, Iterable)
        pad = list(pad)
        assert len(pad) > 0 and len(pad) % 2 == 0
        pad += [0] * (8 - len(pad))
        unpad = np.array(pad).reshape([-1, 2])[::-1].flatten().tolist()
        self.pad = pad
        self.unpad = unpad
        self.mode = mode
        self.value = value
        # TODO(synk): only mode='constant' is implemented in the Pallas kernels
        # (reflect/replicate would need gather-style index math).
        assert mode == 'constant'

    def __call__(self, x):
        if sum(self.pad) != 0:
            return rev_pad2d_forward(x, self.pad, self.value)
        return x

    def invert(self, y):
        u = self.unpad
        return y[u[0]:y.shape[0] - u[1],
                 u[2]:y.shape[1] - u[3],
                 u[4]:y.shape[2] - u[5],
                 u[6]:y.shape[3] - u[7]]


def _reference_pad(x, pad8, value):
    wl, wr, hl, hr, cl, cr, nl, nr = pad8
    return jnp.pad(x, ((nl, nr), (cl, cr), (hl, hr), (wl, wr)),
                   mode='constant', constant_values=value)


if __name__ == "__main__":
    key = jax.random.PRNGKey(0)
    x = jax.random.normal(key, (2, 4, 16, 16), dtype=jnp.float32)

    # Case 1: spatial W+H padding (coarsened 4D kernel, border-only stores).
    m1 = RevPad2D([1, 2, 3, 4], mode='constant', value=0)
    y1 = jax.block_until_ready(m1(x))
    ref1 = _reference_pad(x, m1.pad, m1.value)
    assert y1.shape == ref1.shape
    np.testing.assert_allclose(np.asarray(y1), np.asarray(ref1), atol=0, rtol=0)

    # Case 2: H-only padding with a non-zero fill -> lane-dense flattened kernel.
    m2 = RevPad2D([0, 0, 2, 3], mode='constant', value=1.25)
    y2 = jax.block_until_ready(m2(x))
    ref2 = _reference_pad(x, m2.pad, m2.value)
    assert y2.shape == ref2.shape
    np.testing.assert_allclose(np.asarray(y2), np.asarray(ref2), atol=0, rtol=0)

    # Case 3: padding on W, H, C and N with non-zero fill (general fallback path).
    m3 = RevPad2D([1, 1, 2, 2, 1, 0, 0, 1], mode='constant', value=0.5)
    y3 = jax.block_until_ready(m3(x))
    ref3 = _reference_pad(x, m3.pad, m3.value)
    assert y3.shape == ref3.shape
    np.testing.assert_allclose(np.asarray(y3), np.asarray(ref3), atol=0, rtol=0)

    # Round-trip check: invert(forward(x)) == x
    np.testing.assert_allclose(np.asarray(m3.invert(y3)), np.asarray(x))

    print("KERNEL_OK")
</pallas_src>

<mosaic_0001>
module attributes {stable_mosaic.version = 11 : i64} {
  func.func @_pad_hw_kernel(%arg0: i32, %arg1: i32, %arg2: memref<1x4x16x16xf32, #tpu.memory_space<vmem>>, %arg3: memref<1x4x23x19xf32, #tpu.memory_space<vmem>>) attributes {dimension_semantics = [#tpu.dimension_semantics<parallel>, #tpu.dimension_semantics<parallel>], iteration_bounds = array<i64: 2, 1>, scalar_prefetch = 0 : i64, scratch_operands = 0 : i64, tpu.core_type = #tpu.core_type<tc>, window_params = [{transform_indices = @transform_0, window_bounds = array<i64: 1, 4, 16, 16>}, {transform_indices = @transform_1, window_bounds = array<i64: 1, 4, 23, 19>}]} {
    %cst = arith.constant 0.000000e+00 : f32
    %0 = vector.broadcast %cst : f32 to vector<4x3x19xf32>
    %c0 = arith.constant 0 : index
    %c0_0 = arith.constant 0 : index
    %c0_1 = arith.constant 0 : index
    %c0_2 = arith.constant 0 : index
    %1 = vector.load %arg3[%c0, %c0_0, %c0_1, %c0_2] : memref<1x4x23x19xf32, #tpu.memory_space<vmem>>, vector<1x4x3x19xf32>
    %2 = vector.shape_cast %1 : vector<1x4x3x19xf32> to vector<4x3x19xf32>
    %3 = vector.shape_cast %0 : vector<4x3x19xf32> to vector<1x4x3x19xf32>
    tpu.vector_store %arg3[%c0, %c0_0, %c0_1, %c0_2], %3 {strides = array<i32>} : memref<1x4x23x19xf32, #tpu.memory_space<vmem>>, vector<1x4x3x19xf32>,
    %cst_3 = arith.constant 0.000000e+00 : f32
    %4 = vector.broadcast %cst_3 : f32 to vector<4x4x19xf32>
    %c0_4 = arith.constant 0 : index
    %c0_5 = arith.constant 0 : index
    %c19 = arith.constant 19 : index
    %c0_6 = arith.constant 0 : index
    %5 = vector.load %arg3[%c0_4, %c0_5, %c19, %c0_6] : memref<1x4x23x19xf32, #tpu.memory_space<vmem>>, vector<1x4x4x19xf32>
    %6 = vector.shape_cast %5 : vector<1x4x4x19xf32> to vector<4x4x19xf32>
    %7 = vector.shape_cast %4 : vector<4x4x19xf32> to vector<1x4x4x19xf32>
    tpu.vector_store %arg3[%c0_4, %c0_5, %c19, %c0_6], %7 {strides = array<i32>} : memref<1x4x23x19xf32, #tpu.memory_space<vmem>>, vector<1x4x4x19xf32>,
    %cst_7 = arith.constant 0.000000e+00 : f32
    %8 = vector.broadcast %cst_7 : f32 to vector<4x16x1xf32>
    %c0_8 = arith.constant 0 : index
    %c0_9 = arith.constant 0 : index
    %c3 = arith.constant 3 : index
    %c0_10 = arith.constant 0 : index
    %9 = vector.load %arg3[%c0_8, %c0_9, %c3, %c0_10] : memref<1x4x23x19xf32, #tpu.memory_space<vmem>>, vector<1x4x16x1xf32>
    %10 = vector.shape_cast %9 : vector<1x4x16x1xf32> to vector<4x16x1xf32>
    %11 = vector.shape_cast %8 : vector<4x16x1xf32> to vector<1x4x16x1xf32>
    tpu.vector_store %arg3[%c0_8, %c0_9, %c3, %c0_10], %11 {strides = array<i32>} : memref<1x4x23x19xf32, #tpu.memory_space<vmem>>, vector<1x4x16x1xf32>,
    %cst_11 = arith.constant 0.000000e+00 : f32
    %12 = vector.broadcast %cst_11 : f32 to vector<4x16x2xf32>
    %c0_12 = arith.constant 0 : index
    %c0_13 = arith.constant 0 : index
    %c3_14 = arith.constant 3 : index
    %c17 = arith.constant 17 : index
    %13 = vector.load %arg3[%c0_12, %c0_13, %c3_14, %c17] : memref<1x4x23x19xf32, #tpu.memory_space<vmem>>, vector<1x4x16x2xf32>
    %14 = vector.shape_cast %13 : vector<1x4x16x2xf32> to vector<4x16x2xf32>
    %15 = vector.shape_cast %12 : vector<4x16x2xf32> to vector<1x4x16x2xf32>
    tpu.vector_store %arg3[%c0_12, %c0_13, %c3_14, %c17], %15 {strides = array<i32>} : memref<1x4x23x19xf32, #tpu.memory_space<vmem>>, vector<1x4x16x2xf32>,
    %c0_15 = arith.constant 0 : index
    %c0_16 = arith.constant 0 : index
    %c0_17 = arith.constant 0 : index
    %c0_18 = arith.constant 0 : index
    %16 = vector.load %arg2[%c0_15, %c0_16, %c0_17, %c0_18] : memref<1x4x16x16xf32, #tpu.memory_space<vmem>>, vector<1x4x16x16xf32>
    %17 = vector.shape_cast %16 : vector<1x4x16x16xf32> to vector<4x16x16xf32>
    %c0_19 = arith.constant 0 : index
    %c0_20 = arith.constant 0 : index
    %c3_21 = arith.constant 3 : index
    %c1 = arith.constant 1 : index
    %18 = vector.load %arg3[%c0_19, %c0_20, %c3_21, %c1] : memref<1x4x23x19xf32, #tpu.memory_space<vmem>>, vector<1x4x16x16xf32>
    %19 = vector.shape_cast %18 : vector<1x4x16x16xf32> to vector<4x16x16xf32>
    %20 = vector.shape_cast %17 : vector<4x16x16xf32> to vector<1x4x16x16xf32>
    tpu.vector_store %arg3[%c0_19, %c0_20, %c3_21, %c1], %20 {strides = array<i32>} : memref<1x4x23x19xf32, #tpu.memory_space<vmem>>, vector<1x4x16x16xf32>,
    return
  }
  func.func @transform_0(%arg0: i32, %arg1: i32) -> (i32, i32, i32, i32) {
    %c0_i32 = arith.constant 0 : i32
    %c0_i32_0 = arith.constant 0 : i32
    %c0_i32_1 = arith.constant 0 : i32
    return %arg0, %arg1, %c0_i32, %c0_i32_0 : i32, i32, i32, i32
  }
  func.func @transform_1(%arg0: i32, %arg1: i32) -> (i32, i32, i32, i32) {
    %c0_i32 = arith.constant 0 : i32
    %c0_i32_0 = arith.constant 0 : i32
    %c0_i32_1 = arith.constant 0 : i32
    return %arg0, %arg1, %c0_i32, %c0_i32_0 : i32, i32, i32, i32
  }
}

</mosaic_0001>

<bundles_post_ra>
// kernel: tpu_custom_call.1
= control target key start
LH: loop header
LB: loop body
LE: loop exit
PB: predicated region body
PF: predicated region fallthrough
CT: control target
= control target key end

     0   :  { %6 = vsyncpa [#allocation3], 0  ;;  %s708_s0 = inlined_call_operand.hbm [shape: f32[2,4,16,16], index: 0, kind: input, shape index: {}]   ;;  %s709_s1 = inlined_call_operand.vmem [shape: f32[2,4,23,19], index: 1, kind: output, shape index: {}]  }
   0x1   :  { %8 = vsyncpa [#allocation3 + $0x1], 0  ;;  %s516_s6 = smov 0   ;;  %s518_s7 = smov 0  }
   0x2   :  { %s520_s8 = smov 0   ;;  %s522_s9 = smov 0  }
   0x3   :  { %s524_s10 = smov 0   ;;  %s526_s11 = smov 0  }
   0x4 LB: > { %s346_s12 = sadd.s32 4294967295, %s499_s11   ;;  %s26_s13 = sadd.s32 1, %s495_s10  ;;  %s499_s11 = sphi %s526_s11, %s14_s11   ;;  %s495_s10 = sphi %s524_s10, %s717_s10   ;;  %s491_s9 = sphi %s522_s9, %s716_s9   ;;  %s487_s8 = sphi %s520_s8, %s715_s8   ;;  %s483_s7 = sphi %s518_s7, %s714_s7   ;;  %s479_s6 = sphi %s516_s6, %s713_s6  }
   0x5   : > { %p28_p0 = scmp.ge.s32.totalorder %s26_s13, 2  ;;  %s35_s14 = sadd.s32 1, %s487_s8 }
   0x6   : > { %p42_p1 = scmp.ne.s32.totalorder %s487_s8, %s483_s7  ;;  %p43_p2 = scmp.eq.s32.totalorder %s499_s11, 0 }
   0x7   : > { %s719_s13 = smov (%p28_p0, %s26_s13), 0  ;;  %p48_p4 = scmp.ne.s32.totalorder %s483_s7, %s479_s6 }
   0x8   : > { %p552_p3 = por %p43_p2, %p42_p1  ;;  %s30_s16 = ssub.s32 %s495_s10, %s719_s13 }
   0x9   : > { %p49_p5 = scmp.eq.s32.totalorder %s346_s12, 0  ;;  %p33_p6 = scmp.eq.s32.totalorder %s30_s16, 0 }
   0xa   : > { %p366_p8 = scmp.lt.s32.totalorder %s499_s11, 2  ;;  %s100_s19 = sand.u32 1, %s487_s8  }
   0xb   : > { %p559_p7 = por %p49_p5, %p48_p4  ;;  %s358_s20 = sshll.u32 %s495_s10, 10 }
   0xc   : > { %s565_s18 = scalar_select %p33_p6, %s487_s8, %s35_s14  }
   0xd   : > { %s350_s21 = sshll.u32 %s100_s19, 6  ;;  %s572_s24 = scalar_lea.hbm %s708_s0, %s358_s20 }
   0xe   : > { %s104_s25 = scalar_lea.vmem [#allocation2], %s350_s21  ;;  %p576_p9 = pnand %p366_p8, %p552_p3 }
   0xf   : > { %s114_s26 = sshll.u32 %s104_s25, 4  ;;  %s582_s28 = scalar_lea.sflag [#allocation3], %s100_s19  ;;  %s580_s26 = int_to_ptr.vmem [resolvable:$true] %s114_s26 }
  0x10   : > { %s419_s29 = scalar_lea.hbm %s572_s24, 1024  ;;  %p421_p11 = pneg %p576_p9 }
  0x11   : > { %p420_p10 = scmp.ne.s32.totalorder %s572_s24, %s419_s29  ;;  %s424_s3 = scalar_lea.hbm %s708_s0, 2048 }
  0x12   : > { %p425_p0 = scmp.lt.u32.totalorder %s572_s24, %s708_s0  ;;  %p426_p1 = scmp.lt.u32.totalorder %s424_s3, %s419_s29 }
  0x13   : > { %p422_p12 = pnand %p421_p11, %p420_p10  ;;  %p428_p3 = scmp.lt.u32.totalorder %s419_s29, %s572_s24 }
  0x14   : > { %p427_p2 = por %p426_p1, %p425_p0 }
  0x15   : > { %p423_p13 = pneg %p422_p12 }
  0x16   : > { %p429_p4 = por %p428_p3, %p427_p2 }
  0x18   : > { %p430_p5 = pnand %p429_p4, %p423_p13 }
  0x1a   : > { %433 = shalt.err (!%p430_p5)
}
  0x1b   : > { %s434_s6 = scalar_lea.vmem %s580_s26, 1024  ;;  %s501_s12 = smov [#allocation2]  }
  0x1c   : > { %p435_p6 = scmp.ne.s32.totalorder %s580_s26, %s434_s6  ;;  %s439_s14 = sshll.u32 %s501_s12, 4  ;;  %s440_s14 = int_to_ptr.vmem [resolvable:$false] %s439_s14 }
  0x1d   : > { %s441_s15 = scalar_lea.vmem %s440_s14, 2048  ;;  %p442_p12 = scmp.lt.s32.totalorder %s580_s26, %s440_s14 }
  0x1e   : > { %p437_p8 = pnand %p435_p6, %p421_p11  ;;  %p443_p0 = scmp.lt.s32.totalorder %s441_s15, %s434_s6 }
  0x20   : > { %p438_p10 = pneg %p437_p8  ;;  %p444_p1 = por %p443_p0, %p442_p12 }
  0x22   : > { %p445_p2 = pnand %p444_p1, %p438_p10 }
  0x24   : > { %448 = shalt.err (!%p445_p2)
}
  0x25   : > { %s502_s16 = smov 128   ;;  %s503_s19 = smov 8  }
  0x26   : > { %365 = dma.hbm_to_vmem [thread:$0]  (!%p576_p9), %s572_s24, 1024, %s580_s26, %s582_s28, %s502_s16, %s502_s16, %s503_s19  }
  0x27   : > { %p353_p11 = scmp.ge.s32.totalorder %s499_s11, 1  ;;  %p122_p13 = scmp.lt.s32.totalorder %s499_s11, 3 }
  0x29   : > { %p123_p3 = pnand %p353_p11, %p122_p13 }
  0x2a   : > { %s128_s20 = sand.u32 (!%p123_p3), 1, %s483_s7  }
  0x2b   : > { %126 = sbr.rel (%p123_p3) target bundleno = 183 (0xb7), region = 24  ;;  %s354_s21 = sshll.u32 (!%p123_p3), %s128_s20, 6 }
  0x2c   : > { %s129_s22 = scalar_lea.sflag (!%p123_p3), [#allocation3], %s128_s20  ;;  %s613_s23 = scalar_lea.vmem (!%p123_p3), [#allocation2], %s354_s21 }
  0x32   : > { %474 = dma.done.wait (%p559_p7), %s129_s22, 1024  }
  0x33   : > { %476 = vsyncadd (%p559_p7), %s129_s22, 4294966272  ;;  %p158_p9 = scmp.lt.s32.totalorder %s491_s9, 1  ;;  %vm168_vm0 = vcmask 149504   ;;  %vm173_vm1 = vcmask 150528   ;;  %vm178_vm2 = vcmask 7168   ;;  %vm187_vm3 = vcmask 154760  }
  0x34   : > { %v198_v0 = vld [vmem:[%s613_s23 + $0x10] sm:$0xff]  ;;  %v196_v1 = vld [vmem:[%s613_s23] sm:$0xff]  ;;  %v504_v2 = vmov 0.0   ;;  %v199_v3 = vld [vmem:[%s613_s23 + $0x18] sm:$0xff]  ;;  %vm236_vm4 = vcmask 138248  }
  0x35   : > { %s721_s9 = smov (!%p158_p9, %s491_s9), 1  ;;  %v197_v4 = vld [vmem:[%s613_s23 + $0x8] sm:$0xff]  ;;  %v200_v6 = vld [vmem:[%s613_s23 + $0x20] sm:$0xff]  ;;  %v203_v7 = vld [vmem:[%s613_s23 + $0x38] sm:$0xff] }
  0x36   : > { %s359_s24 = smul.u32 96, %s721_s9  ;;  %s505_s9 = smov 1   ;;  %v201_v5 = vld [vmem:[%s613_s23 + $0x28] sm:$0xff]  ;;  %v202_v8 = vld [vmem:[%s613_s23 + $0x30] sm:$0xff] }
  0x37   : > { %216 = vrot.lane.b32.xlu1 %v198_v0, %s505_s9  ;;  %212 = vrot.lane.b32.xlu0 %v196_v1, %s505_s9 }
  0x38   : > { %s624_s27 = scalar_lea.vmem %s709_s1, %s359_s24 }
  0x39   : > { %169 = vst.msk [vmem:[%s624_s27] sm:$0x7] %vm168_vm0, %v504_v2  ;;  %170 = vst.msk [vmem:[%s624_s27 + $0x18] sm:$0x7] %vm168_vm0, %v504_v2 }
  0x3a   : > { %171 = vst.msk [vmem:[%s624_s27 + $0x30] sm:$0x7] %vm168_vm0, %v504_v2  ;;  %172 = vst.msk [vmem:[%s624_s27 + $0x48] sm:$0x7] %vm168_vm0, %v504_v2 }
  0x3b   : > { %174 = vst.msk [vmem:[%s624_s27 + $0x13] sm:$0xf] %vm173_vm1, %v504_v2  ;;  %175 = vst.msk [vmem:[%s624_s27 + $0x2b] sm:$0xf] %vm173_vm1, %v504_v2  ;;  %218 = vrot.lane.b32.xlu1 %v199_v3, %s505_s9  ;;  %214 = vrot.lane.b32.xlu0 %v197_v4, %s505_s9 }
  0x3c   : > { %176 = vst.msk [vmem:[%s624_s27 + $0x43] sm:$0xf] %vm173_vm1, %v504_v2  ;;  %177 = vst.msk [vmem:[%s624_s27 + $0x5b] sm:$0xf] %vm173_vm1, %v504_v2 }
  0x3d   : > { %181 = vst.msk [vmem:[%s624_s27 + $0x1b] sm:$0xff] %vm178_vm2, %v504_v2  ;;  %179 = vst.msk [vmem:[%s624_s27 + $0x3] sm:$0xff] %vm178_vm2, %v504_v2 }
  0x3e   : > { %180 = vst.msk [vmem:[%s624_s27 + $0xb] sm:$0xff] %vm178_vm2, %v504_v2  ;;  %182 = vst.msk [vmem:[%s624_s27 + $0x23] sm:$0xff] %vm178_vm2, %v504_v2 }
  0x3f   : > { %183 = vst.msk [vmem:[%s624_s27 + $0x33] sm:$0xff] %vm178_vm2, %v504_v2  ;;  %184 = vst.msk [vmem:[%s624_s27 + $0x3b] sm:$0xff] %vm178_vm2, %v504_v2  ;;  %222 = vrot.lane.b32.xlu1 %v201_v5, %s505_s9  ;;  %220 = vrot.lane.b32.xlu0 %v200_v6, %s505_s9 }
  0x40   : > { %185 = vst.msk [vmem:[%s624_s27 + $0x4b] sm:$0xff] %vm178_vm2, %v504_v2  ;;  %186 = vst.msk [vmem:[%s624_s27 + $0x53] sm:$0xff] %vm178_vm2, %v504_v2 }
  0x41   : > { %190 = vst.msk [vmem:[%s624_s27 + $0x1b] sm:$0xff] %vm187_vm3, %v504_v2  ;;  %188 = vst.msk [vmem:[%s624_s27 + $0x3] sm:$0xff] %vm187_vm3, %v504_v2 }
  0x42   : > { %189 = vst.msk [vmem:[%s624_s27 + $0xb] sm:$0xff] %vm187_vm3, %v504_v2  ;;  %191 = vst.msk [vmem:[%s624_s27 + $0x23] sm:$0xff] %vm187_vm3, %v504_v2 }
  0x43   : > { %192 = vst.msk [vmem:[%s624_s27 + $0x33] sm:$0xff] %vm187_vm3, %v504_v2  ;;  %193 = vst.msk [vmem:[%s624_s27 + $0x3b] sm:$0xff] %vm187_vm3, %v504_v2  ;;  %226 = vrot.lane.b32.xlu1 %v203_v7, %s505_s9  ;;  %224 = vrot.lane.b32.xlu0 %v202_v8, %s505_s9 }
  0x44   : > { %194 = vst.msk [vmem:[%s624_s27 + $0x4b] sm:$0xff] %vm187_vm3, %v504_v2  ;;  %195 = vst.msk [vmem:[%s624_s27 + $0x53] sm:$0xff] %vm187_vm3, %v504_v2 }
  0xa9   : > { %v217_v9 = vpop.permute.xlu1 %216  ;;  %v213_v10 = vpop.permute.xlu0 %212 }
  0xaa   : > { %239 = vst.msk [vmem:[%s624_s27 + $0x1b] sm:$0xff] %vm236_vm4, %v217_v9  ;;  %237 = vst.msk [vmem:[%s624_s27 + $0x3] sm:$0xff] %vm236_vm4, %v213_v10 }
  0xad   : > { %v219_v11 = vpop.permute.xlu1 %218  ;;  %v215_v12 = vpop.permute.xlu0 %214 }
  0xae   : > { %240 = vst.msk [vmem:[%s624_s27 + $0x23] sm:$0xff] %vm236_vm4, %v219_v11  ;;  %238 = vst.msk [vmem:[%s624_s27 + $0xb] sm:$0xff] %vm236_vm4, %v215_v12 }
  0xb1   : > { %v223_v13 = vpop.permute.xlu1 %222  ;;  %v221_v14 = vpop.permute.xlu0 %220 }
  0xb2   : > { %242 = vst.msk [vmem:[%s624_s27 + $0x3b] sm:$0xff] %vm236_vm4, %v223_v13  ;;  %241 = vst.msk [vmem:[%s624_s27 + $0x33] sm:$0xff] %vm236_vm4, %v221_v14 }
  0xb5   : > { %v227_v15 = vpop.permute.xlu1 %226  ;;  %v225_v16 = vpop.permute.xlu0 %224 }
  0xb6   : > { %244 = vst.msk [vmem:[%s624_s27 + $0x53] sm:$0xff] %vm236_vm4, %v227_v15  ;;  %243 = vst.msk [vmem:[%s624_s27 + $0x4b] sm:$0xff] %vm236_vm4, %v225_v16 }
  0xb7 PF: > { %s14_s11 = sadd.s32 1, %s499_s11   ;;  %s713_s6 = smov %s483_s7 }
  0xb8   : > { %p11_p7 = scmp.ge.s32.totalorder %s14_s11, 4   ;;  %s714_s7 = smov %s487_s8 }
  0xb9   : > { %s715_s8 = smov %s565_s18  ;;  %s716_s9 = smov %s495_s10 }
  0xba   : > { %s717_s10 = smov %s719_s13  ;;  %13 = sbr.rel (!%p11_p7) target bundleno = 4 (0x4), region = 64 }
  0xc1   :  { %277 = vsyncpa [#allocation3], 1 }
  0xc2   :  { %279 = vsyncpa [#allocation3 + $0x1], 1 }

</bundles_post_ra>
